<compile_context>
chip_gen: v7x
topology: tpu7x:2x2x1
jax: 0.10.0
libtpu: 0.0.40
codegen_flags: <defaults>
</compile_context>

<pallas_src>
import jax
import jax.numpy as jnp
from jax.experimental import pallas as pl
from jax.experimental.pallas import tpu as pltpu


# ---------------------------------------------------------------------------
# Fused Pallas kernel: GCN layer + v_net MLP
# ---------------------------------------------------------------------------
def _gcn_critic_kernel(x_ref, mg_ref, bg_ref,
                       w1_ref, b1_ref, w2_ref, b2_ref, w3t_ref, b3_ref,
                       o_ref):
    # ---- GCN layer: relu(A_hat @ X @ Wg + bg), folded into one (N*F, N*F) operator ----
    # x: (TB, N*F) (f32 or bf16), mg: (N*F, N*F) -> batch rides the MXU M dimension.
    acc = jnp.dot(x_ref[...], mg_ref[...], preferred_element_type=jnp.float32)
    h = jnp.maximum(acc + bg_ref[...], 0.0)                                  # ReLU, f32

    # ---- v_net MLP: Linear -> tanh -> Linear -> tanh -> Linear(->1) ----
    h = jnp.tanh(jnp.dot(h.astype(w1_ref.dtype), w1_ref[...],
                         preferred_element_type=jnp.float32) + b1_ref[...])
    h = jnp.tanh(jnp.dot(h.astype(w2_ref.dtype), w2_ref[...],
                         preferred_element_type=jnp.float32) + b2_ref[...])

    # Last (h2 -> 1) layer as a VPU/XLU lane reduction instead of a 1-wide MXU matmul.
    v = jnp.sum(h * w3t_ref[...], axis=-1, keepdims=True) + b3_ref[0]        # (TB, 1)

    # Contiguous (TB, 1) store: 4 bytes per batch element (no broadcast amplification).
    o_ref[...] = v.astype(o_ref.dtype)


# ---------------------------------------------------------------------------
# Sizing helpers
# ---------------------------------------------------------------------------
def _round_up(x, m):
    return (x + m - 1) // m * m


def _vmem_capacity_bytes():
    try:
        return int(pltpu.get_tpu_info().vmem_capacity_bytes)
    except Exception:
        return 64 * 1024 * 1024   # v7x floor; v5e/v6e have 128 MiB


def _pick_batch_tile(B, nf, h1, h2, in_bytes, vmem_cap):
    """Largest batch tile that fits VMEM; 256-multiples for the v6e/v7x MXU; >=2 grid
    steps when possible (v7x megacore); prefer tiles that divide B (skip the pad copy)."""
    f32 = 4
    # Resident operands (auto-pipeline double-buffers even constant-index blocks).
    resident = 2 * ((nf * nf + nf * h1 + h1 * h2) * in_bytes + (nf + h1 + 2 * h2) * f32)
    budget = max(2 << 20, vmem_cap // 2 - resident)
    # Per-batch-row cost inside one tile: double-buffered x/out tiles + f32 body temporaries.
    per_row = 2 * nf * in_bytes + 2 * f32 + f32 * (nf + h1 + 2 * h2 + 8)
    cap_rows = max(8, budget // per_row)
    # >= 2 grid steps when the batch allows it -> both TensorCores on v7x (free on v5e/v6e).
    target = max(1, -(-B // 2))
    tb = max(8, min(cap_rows, target, 1024))
    tb = tb // 256 * 256 if tb >= 256 else _round_up(tb, 8)
    # Prefer a tile that divides B exactly: removes the extra jnp.pad HBM pass over x.
    for cand in range(tb, 7, -8):
        if B % cand == 0:
            if cand >= tb // 2:
                tb = cand
            break
    return int(tb)


def _vmem_limit_bytes(tb, nf, h1, h2, in_bytes, vmem_cap):
    f32 = 4
    io = 2 * tb * nf * in_bytes + 2 * tb * f32                                # dbl-buffered x / out tiles
    resident = 2 * ((nf * nf + nf * h1 + h1 * h2) * in_bytes
                    + (nf + h1 + 2 * h2) * f32)                               # dbl-buffered weights/biases
    body = tb * (nf + h1 + 2 * h2 + 8) * f32                                  # in-body f32 temporaries
    need = io + resident + body
    if need > int(0.9 * vmem_cap):
        raise ValueError(
            "kron-folded GCN operator no longer fits VMEM "
            f"(need ~{need >> 20} MiB, cap {vmem_cap >> 20} MiB). For large N*F, tile the "
            "(N*F, N*F) operator along a K grid axis with a VMEM accumulator (P3), or split "
            "the GCN back into two lane-friendly matmuls with batch on M.")
    return int(min(int(0.9 * vmem_cap), max(32 << 20, 2 * need)))


# ---------------------------------------------------------------------------
# Glue: adjacency normalization, parameter init, one-time fold, full forward
# ---------------------------------------------------------------------------
def normalized_adjacency(edge_index, n):
    """D^-1/2 (A + I) D^-1/2. Hoisted out of the per-forward path (edge_index is static)."""
    src, dst = edge_index[0], edge_index[1]
    a = jnp.zeros((n, n), jnp.float32).at[src, dst].set(1.0)
    a = jnp.maximum(a, a.T)                 # treat graph as undirected
    a = a + jnp.eye(n, dtype=jnp.float32)
    deg = jnp.sum(a, axis=-1)
    dinv = 1.0 / jnp.sqrt(deg)
    return a * dinv[:, None] * dinv[None, :]


def init_params(key, feature_num, node_num, hidden_sizes):
    ks = jax.random.split(key, 4)

    def lin(k, fan_in, fan_out):
        bound = 1.0 / jnp.sqrt(jnp.float32(fan_in))
        w = jax.random.uniform(k, (fan_in, fan_out), jnp.float32, -bound, bound)
        b = jnp.zeros((1, fan_out), jnp.float32)
        return w, b

    w_g, b_g = lin(ks[0], feature_num, feature_num)      # GCN weight / bias
    in_dim = feature_num * node_num
    h1, h2 = hidden_sizes
    w1, b1 = lin(ks[1], in_dim, h1)
    w2, b2 = lin(ks[2], h1, h2)
    w3, b3 = lin(ks[3], h2, 1)
    return (w_g, b_g), (w1, b1, w2, b2, w3, b3)


def prepare_gcn_critic(a_hat, gcn_params, mlp_params, compute_dtype=jnp.bfloat16):
    """One-time fold of the GCN into a dense (N*F, N*F) operator + dtype casts.

    Hoisted out of the per-forward path so the O((N*F)^2) kron and the weight casts are not
    re-materialised in HBM on every call.  compute_dtype=bf16 (default) halves HBM traffic on
    v6e/v7x; use jnp.float32 for bit-closer numerics vs. the PyTorch f32 module.
    """
    w_g, b_g = gcn_params
    w1, b1, w2, b2, w3, b3 = mlp_params
    n = a_hat.shape[0]
    # (A_hat @ X @ Wg).reshape(B, N*F) == X.reshape(B, N*F) @ kron(A_hat^T, Wg)   (exact).
    mg = jnp.kron(a_hat.T, w_g).astype(compute_dtype)          # (N*F, N*F) folded operator
    bg = jnp.tile(b_g, (1, n)).astype(jnp.float32)             # (1, N*F) bias over nodes
    return dict(
        mg=mg,
        bg=bg,
        w1=w1.astype(compute_dtype), b1=b1.astype(jnp.float32),
        w2=w2.astype(compute_dtype), b2=b2.astype(jnp.float32),
        w3t=w3.reshape(1, -1).astype(jnp.float32),             # (1, h2) row for the VPU reduction
        b3=b3.reshape(-1).astype(jnp.float32),                 # (1,) scalar -> SMEM
    )


def gcn_critic_forward(feature_matrix, folded):
    """feature_matrix: (B, N, F) f32, folded: output of prepare_gcn_critic -> (B,) f32."""
    B, N, F = feature_matrix.shape
    mg, bg = folded["mg"], folded["bg"]
    w1, b1 = folded["w1"], folded["b1"]
    w2, b2 = folded["w2"], folded["b2"]
    w3t, b3 = folded["w3t"], folded["b3"]
    nf = N * F
    h1 = w1.shape[1]
    h2 = w2.shape[1]
    in_bytes = jnp.dtype(mg.dtype).itemsize

    vmem_cap = _vmem_capacity_bytes()
    tb = _pick_batch_tile(B, nf, h1, h2, in_bytes, vmem_cap)
    Bp = _round_up(B, tb)

    x_flat = feature_matrix.reshape(B, nf).astype(mg.dtype)
    if Bp != B:
        # Only hit when no multiple-of-8 tile divides B (e.g. tiny / odd batch sizes).
        x_flat = jnp.pad(x_flat, ((0, Bp - B), (0, 0)))

    # NOTE: the small row vectors (bg, b1, b2, w3t) are kept as separate resident operands
    # rather than concatenated+sliced in-kernel: the slice boundaries would not be 128-lane
    # aligned and the DMA-descriptor saving is negligible at these sizes.
    grid_spec = pltpu.PrefetchScalarGridSpec(
        num_scalar_prefetch=0,
        grid=(Bp // tb,),
        in_specs=[
            pl.BlockSpec((tb, nf), lambda b: (b, 0)),        # x tile (streams over batch)
            pl.BlockSpec((nf, nf), lambda b: (0, 0)),        # folded GCN operator (resident)
            pl.BlockSpec((1, nf), lambda b: (0, 0)),         # GCN bias (flattened, resident)
            pl.BlockSpec((nf, h1), lambda b: (0, 0)),        # w1 (resident)
            pl.BlockSpec((1, h1), lambda b: (0, 0)),         # b1
            pl.BlockSpec((h1, h2), lambda b: (0, 0)),        # w2
            pl.BlockSpec((1, h2), lambda b: (0, 0)),         # b2
            pl.BlockSpec((1, h2), lambda b: (0, 0)),         # w3^T row (VPU reduction)
            pl.BlockSpec(memory_space=pltpu.MemorySpace.SMEM),  # b3 scalar
        ],
        out_specs=pl.BlockSpec((tb, 1), lambda b: (b, 0)),   # 4 B / batch element
    )

    out = pl.pallas_call(
        _gcn_critic_kernel,
        out_shape=jax.ShapeDtypeStruct((Bp, 1), jnp.float32),
        grid_spec=grid_spec,
        compiler_params=pltpu.CompilerParams(
            dimension_semantics=("parallel",),               # batch tiles -> both TCs on v7x
            vmem_limit_bytes=_vmem_limit_bytes(tb, nf, h1, h2, in_bytes, vmem_cap),
        ),
    )(x_flat, mg, bg, w1, b1, w2, b2, w3t, b3)

    return out[:B, 0]                                         # == torch.squeeze(v, -1)


def gcn_critic_reference(feature_matrix, a_hat, gcn_params, mlp_params):
    """Pure-JAX reference (same math, unfused, f32 highest precision)."""
    w_g, b_g = gcn_params
    w1, b1, w2, b2, w3, b3 = mlp_params
    agg = jnp.einsum("ij,bjf->bif", a_hat, feature_matrix, precision="highest")
    h = jnp.maximum(jnp.matmul(agg, w_g, precision="highest") + b_g, 0.0)
    h = h.reshape(feature_matrix.shape[0], -1)
    h = jnp.tanh(jnp.matmul(h, w1, precision="highest") + b1)
    h = jnp.tanh(jnp.matmul(h, w2, precision="highest") + b2)
    return jnp.squeeze(jnp.matmul(h, w3, precision="highest") + b3, -1)


# ---------------------------------------------------------------------------
if __name__ == "__main__":
    B, N, F = 2, 8, 4                    # batch, node_num, feature_num
    hidden_sizes = (32, 32)

    key = jax.random.PRNGKey(0)
    k_feat, k_param = jax.random.split(key)

    feature_matrix = jax.random.normal(k_feat, (B, N, F), jnp.float32)
    # deterministic ring graph edges
    src = jnp.arange(N, dtype=jnp.int32)
    dst = (src + 1) % N
    edge_index = jnp.stack([src, dst], axis=0)                 # (2, E)

    gcn_params, mlp_params = init_params(k_param, F, N, hidden_sizes)
    a_hat = normalized_adjacency(edge_index, N)                # hoisted (edge_index static)
    ref = gcn_critic_reference(feature_matrix, a_hat, gcn_params, mlp_params)

    forward = jax.jit(gcn_critic_forward)

    # f32 path: matches the PyTorch f32 module; in-kernel MXU default precision
    # (bf16-class multiplicands, f32 accumulate) -> documented 2e-2 tolerance.
    folded_f32 = prepare_gcn_critic(a_hat, gcn_params, mlp_params, compute_dtype=jnp.float32)
    out_f32 = forward(feature_matrix, folded_f32)
    jax.block_until_ready(out_f32)
    assert out_f32.shape == (B,)
    if not bool(jnp.allclose(out_f32, ref, rtol=2e-2, atol=2e-2)):
        raise AssertionError("f32 Pallas kernel disagrees with JAX reference")

    # bf16 streaming path (recommended on v6e/v7x): half the HBM bytes for x + weights,
    # f32 accumulation/activations in-kernel; documented looser tolerance.
    folded_bf16 = prepare_gcn_critic(a_hat, gcn_params, mlp_params, compute_dtype=jnp.bfloat16)
    out_bf16 = forward(feature_matrix, folded_bf16)
    jax.block_until_ready(out_bf16)
    assert out_bf16.shape == (B,)
    if not bool(jnp.allclose(out_bf16, ref, rtol=5e-2, atol=5e-2)):
        raise AssertionError("bf16 Pallas kernel disagrees with JAX reference")

    print("KERNEL_OK")
</pallas_src>

<mosaic_0001>
module attributes {stable_mosaic.version = 11 : i64} {
  func.func @_gcn_critic_kernel(%arg0: i32, %arg1: memref<8x32xf32, #tpu.memory_space<vmem>>, %arg2: memref<32x32xf32, #tpu.memory_space<vmem>>, %arg3: memref<1x32xf32, #tpu.memory_space<vmem>>, %arg4: memref<32x32xf32, #tpu.memory_space<vmem>>, %arg5: memref<1x32xf32, #tpu.memory_space<vmem>>, %arg6: memref<32x32xf32, #tpu.memory_space<vmem>>, %arg7: memref<1x32xf32, #tpu.memory_space<vmem>>, %arg8: memref<1x32xf32, #tpu.memory_space<vmem>>, %arg9: memref<1xf32, #tpu.memory_space<smem>>, %arg10: memref<8x1xf32, #tpu.memory_space<vmem>>) attributes {dimension_semantics = [#tpu.dimension_semantics<parallel>], iteration_bounds = array<i64: 1>, scalar_prefetch = 0 : i64, scratch_operands = 0 : i64, tpu.core_type = #tpu.core_type<tc>, window_params = [{transform_indices = @transform_0, window_bounds = array<i64: 8, 32>}, {pipeline_mode = #tpu.pipeline_mode<synchronous>, transform_indices = @transform_1, window_bounds = array<i64: 32, 32>}, {pipeline_mode = #tpu.pipeline_mode<synchronous>, transform_indices = @transform_2, window_bounds = array<i64: 1, 32>}, {pipeline_mode = #tpu.pipeline_mode<synchronous>, transform_indices = @transform_3, window_bounds = array<i64: 32, 32>}, {pipeline_mode = #tpu.pipeline_mode<synchronous>, transform_indices = @transform_4, window_bounds = array<i64: 1, 32>}, {pipeline_mode = #tpu.pipeline_mode<synchronous>, transform_indices = @transform_5, window_bounds = array<i64: 32, 32>}, {pipeline_mode = #tpu.pipeline_mode<synchronous>, transform_indices = @transform_6, window_bounds = array<i64: 1, 32>}, {pipeline_mode = #tpu.pipeline_mode<synchronous>, transform_indices = @transform_7, window_bounds = array<i64: 1, 32>}, {transform_indices = @transform_8, window_bounds = array<i64: 1>}, {transform_indices = @transform_9, window_bounds = array<i64: 8, 1>}]} {
    %c0 = arith.constant 0 : index
    %c0_0 = arith.constant 0 : index
    %0 = vector.load %arg1[%c0, %c0_0] : memref<8x32xf32, #tpu.memory_space<vmem>>, vector<8x32xf32>
    %c0_1 = arith.constant 0 : index
    %c0_2 = arith.constant 0 : index
    %1 = vector.load %arg2[%c0_1, %c0_2] : memref<32x32xf32, #tpu.memory_space<vmem>>, vector<32x32xf32>
    %cst = arith.constant dense<0.000000e+00> : vector<8x32xf32>
    %2 = tpu.matmul %0, %1, %cst {dimension_numbers = #tpu.dot_dimension_numbers<[1], [0], [0], [1], [0, 0, 1, 1], [], []>} : vector<8x32xf32>, vector<32x32xf32>, vector<8x32xf32> -> vector<8x32xf32>
    %c0_3 = arith.constant 0 : index
    %c0_4 = arith.constant 0 : index
    %3 = vector.load %arg3[%c0_3, %c0_4] : memref<1x32xf32, #tpu.memory_space<vmem>>, vector<1x32xf32>
    %4 = vector.broadcast %3 : vector<1x32xf32> to vector<8x32xf32>
    %5 = arith.addf %2, %4 : vector<8x32xf32>
    %cst_5 = arith.constant 0.000000e+00 : f32
    %6 = vector.broadcast %cst_5 : f32 to vector<8x32xf32>
    %7 = arith.maximumf %5, %6 : vector<8x32xf32>
    %c0_6 = arith.constant 0 : index
    %c0_7 = arith.constant 0 : index
    %8 = vector.load %arg4[%c0_6, %c0_7] : memref<32x32xf32, #tpu.memory_space<vmem>>, vector<32x32xf32>
    %cst_8 = arith.constant dense<0.000000e+00> : vector<8x32xf32>
    %9 = tpu.matmul %7, %8, %cst_8 {dimension_numbers = #tpu.dot_dimension_numbers<[1], [0], [0], [1], [0, 0, 1, 1], [], []>} : vector<8x32xf32>, vector<32x32xf32>, vector<8x32xf32> -> vector<8x32xf32>
    %c0_9 = arith.constant 0 : index
    %c0_10 = arith.constant 0 : index
    %10 = vector.load %arg5[%c0_9, %c0_10] : memref<1x32xf32, #tpu.memory_space<vmem>>, vector<1x32xf32>
    %11 = vector.broadcast %10 : vector<1x32xf32> to vector<8x32xf32>
    %12 = arith.addf %9, %11 : vector<8x32xf32>
    %13 = math.tanh %12 : vector<8x32xf32>
    %c0_11 = arith.constant 0 : index
    %c0_12 = arith.constant 0 : index
    %14 = vector.load %arg6[%c0_11, %c0_12] : memref<32x32xf32, #tpu.memory_space<vmem>>, vector<32x32xf32>
    %cst_13 = arith.constant dense<0.000000e+00> : vector<8x32xf32>
    %15 = tpu.matmul %13, %14, %cst_13 {dimension_numbers = #tpu.dot_dimension_numbers<[1], [0], [0], [1], [0, 0, 1, 1], [], []>} : vector<8x32xf32>, vector<32x32xf32>, vector<8x32xf32> -> vector<8x32xf32>
    %c0_14 = arith.constant 0 : index
    %c0_15 = arith.constant 0 : index
    %16 = vector.load %arg7[%c0_14, %c0_15] : memref<1x32xf32, #tpu.memory_space<vmem>>, vector<1x32xf32>
    %17 = vector.broadcast %16 : vector<1x32xf32> to vector<8x32xf32>
    %18 = arith.addf %15, %17 : vector<8x32xf32>
    %19 = math.tanh %18 : vector<8x32xf32>
    %c0_16 = arith.constant 0 : index
    %c0_17 = arith.constant 0 : index
    %20 = vector.load %arg8[%c0_16, %c0_17] : memref<1x32xf32, #tpu.memory_space<vmem>>, vector<1x32xf32>
    %21 = vector.broadcast %20 : vector<1x32xf32> to vector<8x32xf32>
    %22 = arith.mulf %19, %21 : vector<8x32xf32>
    %cst_18 = arith.constant dense<0.000000e+00> : vector<8xf32>
    %23 = vector.multi_reduction <add>, %22, %cst_18 [1] : vector<8x32xf32> to vector<8xf32>
    %24 = vector.shape_cast %23 : vector<8xf32> to vector<8x1xf32>
    %c0_19 = arith.constant 0 : index
    %25 = memref.load %arg9[%c0_19] : memref<1xf32, #tpu.memory_space<smem>>
    %26 = vector.broadcast %25 : f32 to vector<8x1xf32>
    %27 = arith.addf %24, %26 : vector<8x1xf32>
    %c0_20 = arith.constant 0 : index
    %c0_21 = arith.constant 0 : index
    %28 = vector.load %arg10[%c0_20, %c0_21] : memref<8x1xf32, #tpu.memory_space<vmem>>, vector<8x1xf32>
    tpu.vector_store %arg10[%c0_20, %c0_21], %27 {strides = array<i32>} : memref<8x1xf32, #tpu.memory_space<vmem>>, vector<8x1xf32>,
    return
  }
  func.func @transform_0(%arg0: i32) -> (i32, i32) {
    %c0_i32 = arith.constant 0 : i32
    %c0_i32_0 = arith.constant 0 : i32
    return %arg0, %c0_i32 : i32, i32
  }
  func.func @transform_1(%arg0: i32) -> (i32, i32) {
    %c0_i32 = arith.constant 0 : i32
    %c0_i32_0 = arith.constant 0 : i32
    %c0_i32_1 = arith.constant 0 : i32
    return %c0_i32, %c0_i32_0 : i32, i32
  }
  func.func @transform_2(%arg0: i32) -> (i32, i32) {
    %c0_i32 = arith.constant 0 : i32
    %c0_i32_0 = arith.constant 0 : i32
    %c0_i32_1 = arith.constant 0 : i32
    return %c0_i32, %c0_i32_0 : i32, i32
  }
  func.func @transform_3(%arg0: i32) -> (i32, i32) {
    %c0_i32 = arith.constant 0 : i32
    %c0_i32_0 = arith.constant 0 : i32
    %c0_i32_1 = arith.constant 0 : i32
    return %c0_i32, %c0_i32_0 : i32, i32
  }
  func.func @transform_4(%arg0: i32) -> (i32, i32) {
    %c0_i32 = arith.constant 0 : i32
    %c0_i32_0 = arith.constant 0 : i32
    %c0_i32_1 = arith.constant 0 : i32
    return %c0_i32, %c0_i32_0 : i32, i32
  }
  func.func @transform_5(%arg0: i32) -> (i32, i32) {
    %c0_i32 = arith.constant 0 : i32
    %c0_i32_0 = arith.constant 0 : i32
    %c0_i32_1 = arith.constant 0 : i32
    return %c0_i32, %c0_i32_0 : i32, i32
  }
  func.func @transform_6(%arg0: i32) -> (i32, i32) {
    %c0_i32 = arith.constant 0 : i32
    %c0_i32_0 = arith.constant 0 : i32
    %c0_i32_1 = arith.constant 0 : i32
    return %c0_i32, %c0_i32_0 : i32, i32
  }
  func.func @transform_7(%arg0: i32) -> (i32, i32) {
    %c0_i32 = arith.constant 0 : i32
    %c0_i32_0 = arith.constant 0 : i32
    %c0_i32_1 = arith.constant 0 : i32
    return %c0_i32, %c0_i32_0 : i32, i32
  }
  func.func @transform_8(%arg0: i32) -> i32 {
    %c0_i32 = arith.constant 0 : i32
    %c0_i32_0 = arith.constant 0 : i32
    return %c0_i32 : i32
  }
  func.func @transform_9(%arg0: i32) -> (i32, i32) {
    %c0_i32 = arith.constant 0 : i32
    %c0_i32_0 = arith.constant 0 : i32
    return %arg0, %c0_i32 : i32, i32
  }
}

</mosaic_0001>

<bundles_post_ra>
// kernel: gcn_critic_forward.1
= control target key start
LH: loop header
LB: loop body
LE: loop exit
PB: predicated region body
PF: predicated region fallthrough
CT: control target
= control target key end

     0   :  { %15 = vsyncpa [#allocation4], 0  ;;  %s600_s0 = inlined_call_operand.vmem [shape: f32[8,32], index: 0, kind: input, shape index: {}]   ;;  %s601_s1 = inlined_call_operand.vmem [shape: f32[32,32], index: 1, kind: input, shape index: {}]   ;;  %s602_s2 = inlined_call_operand.vmem [shape: f32[1,32], index: 2, kind: input, shape index: {}]   ;;  %s603_s3 = inlined_call_operand.vmem [shape: f32[32,32], index: 3, kind: input, shape index: {}]   ;;  %s604_s4 = inlined_call_operand.vmem [shape: f32[1,32], index: 4, kind: input, shape index: {}]   ;;  %s605_s5 = inlined_call_operand.hbm [shape: f32[32,32], index: 5, kind: input, shape index: {}]   ;;  %s606_s6 = inlined_call_operand.vmem [shape: f32[1,32], index: 6, kind: input, shape index: {}]   ;;  %s607_s7 = inlined_call_operand.hbm [shape: f32[1,32], index: 7, kind: input, shape index: {}]   ;;  %s608_s8 = inlined_call_operand.<no memory space> [shape: f32[1], index: 8, kind: input, shape index: {}]   ;;  %s609_s9 = inlined_call_operand.vmem [shape: f32[8,1], index: 9, kind: output, shape index: {}]  }
   0x1   :  { %16 = vsyncpa [#allocation6], 0  ;;  %s470_s30 = smov [#allocation3]   ;;  %s422_s13 = scalar_lea.hbm %s605_s5, 512 }
   0x2   :  { %s32_s10 = sshll.u32 %s470_s30, 4  ;;  %p423_p0 = scmp.ne.s32.totalorder %s605_s5, %s422_s13  ;;  %s33_s10 = int_to_ptr.vmem [resolvable:$true] %s32_s10 }
   0x3   :  { %p426_p1 = scmp.lt.u32.totalorder %s422_s13, %s605_s5 }
   0x5   :  { %p428_p2 = pnand %p426_p1, %p423_p0 }
   0x7   :  { %431 = shalt.err (!%p428_p2)
}
   0x8   :  { %s432_s18 = scalar_lea.vmem %s33_s10, 512  ;;  %p437_p4 = scmp.lt.s32.totalorder %s33_s10, %s33_s10 }
   0x9   :  { %p433_p3 = scmp.ne.s32.totalorder %s33_s10, %s432_s18  ;;  %p438_p5 = scmp.lt.s32.totalorder %s432_s18, %s432_s18 }
   0xb   :  { %p439_p6 = por %p438_p5, %p437_p4 }
   0xd   :  { %p440_p7 = pnand %p439_p6, %p433_p3 }
   0xf   :  { %443 = shalt.err (!%p440_p7)
}
  0x10   :  { %s471_s19 = smov 128   ;;  %s472_s20 = smov 8  }
  0x11   :  { %38 = dma.hbm_to_vmem [thread:$0]  %s605_s5, 512, %s33_s10, [#allocation4], %s471_s19, %s471_s19, %s472_s20  }
  0x12   :  { %s473_s23 = smov [#allocation5]   ;;  %s444_s27 = scalar_lea.hbm %s607_s7, 16 }
  0x13   :  { %s47_s24 = sshll.u32 %s473_s23, 4  ;;  %p445_p8 = scmp.ne.s32.totalorder %s607_s7, %s444_s27  ;;  %s48_s24 = int_to_ptr.vmem [resolvable:$true] %s47_s24 }
  0x14   :  { %p448_p9 = scmp.lt.u32.totalorder %s444_s27, %s607_s7 }
  0x16   :  { %p450_p10 = pnand %p448_p9, %p445_p8 }
  0x18   :  { %453 = shalt.err (!%p450_p10)
}
  0x19   :  { %s454_s12 = scalar_lea.vmem %s48_s24, 16  ;;  %s458_s5 = scalar_lea.vmem %s48_s24, 32 }
  0x1a   :  { %p455_p11 = scmp.ne.s32.totalorder %s48_s24, %s454_s12  ;;  %p459_p12 = scmp.lt.s32.totalorder %s48_s24, %s48_s24 }
  0x1b   :  { %p460_p13 = scmp.lt.s32.totalorder %s458_s5, %s454_s12 }
  0x1d   :  { %p461_p0 = por %p460_p13, %p459_p12 }
  0x1f   :  { %p462_p1 = pnand %p461_p0, %p455_p11 }
  0x21   :  { %465 = shalt.err (!%p462_p1)
}
  0x22   :  { %50 = dma.hbm_to_vmem [thread:$0]  %s607_s7, 16, %s48_s24, [#allocation6]  }
  0x23   :  { %466 = dma.done.wait [#allocation4], 512  }
  0x24   :  { %467 = vsyncadd [#allocation4], 4294966784 }
  0x25   :  { %468 = dma.done.wait [#allocation6], 16  }
  0x26   :  { %469 = vsyncadd [#allocation6], 4294967280  ;;  %v474_v0 = vmov 0.0|0.0   ;;  %vm475_vm0 = vmmov 0   ;;  %v476_v1 = vmov 0.0   ;;  %v60_v2 = vld [vmem:[%s601_s1] sm:$0xff]  ;;  %v328_v39 = vstv %s608_s8 }
  0x27   :  { %393 = vmatprep.subr.bf16.mxu0 %v474_v0  ;;  %368 = vmatprep.mubr.msk.f32.mxu0 %vm475_vm0, %v476_v1  ;;  %v61_v3 = vld [vmem:[%s601_s1 + $0x8] sm:$0xff]  ;;  %v62_v4 = vld [vmem:[%s601_s1 + $0x10] sm:$0xff]  ;;  %v63_v6 = vld [vmem:[%s601_s1 + $0x18] sm:$0xff]  ;;  %vm71_vm1 = vcmask 261120   ;;  %vm330_vm2 = vcmask 7168  }
  0x28   :  { %399 = vmatprep.subr.bf16.mxu1 %v474_v0  ;;  %379 = vmatprep.mubr.msk.f32.mxu1 %vm475_vm0, %v476_v1  ;;  %v394_v5 = vpack.c.bf16 %v61_v3, %v60_v2  ;;  %v146_v7 = vld [vmem:[%s603_s3] sm:$0xff]  ;;  %v147_v8 = vld [vmem:[%s603_s3 + $0x8] sm:$0xff]  ;;  %v397_v9 = vpack.c.bf16 %v63_v6, %v62_v4  ;;  %v148_v12 = vld [vmem:[%s603_s3 + $0x10] sm:$0xff] }
  0x29   :  { %v400_v10 = vpack.c.bf16 %v147_v8, %v146_v7  ;;  %v59_v11 = vld [vmem:[%s600_s0] sm:$0xff]  ;;  %v149_v13 = vld [vmem:[%s603_s3 + $0x18] sm:$0xff]  ;;  %v232_v21 = vld [vmem:[#allocation3 + $0x8] sm:$0xff] }
  0x2a   :  { %395 = vmatpush3.bf16.msra.mxu0 %v394_v5  ;;  %v403_v14 = vpack.c.bf16 %v149_v13, %v148_v12  ;;  %v338_v15 = vld [vmem:[%s602_s2] ss:$0 sm:$0xff]  ;;  %v233_v22 = vld [vmem:[#allocation3 + $0x10] sm:$0xff]  ;;  %v234_v24 = vld [vmem:[#allocation3 + $0x18] sm:$0xff] }
  0x2b   :  { %396 = vmatprep.subr.bf16.mxu0 %v474_v0  ;;  %401 = vmatpush3.bf16.msra.mxu1 %v400_v10  ;;  %v231_v20 = vld [vmem:[#allocation3] sm:$0xff]  ;;  %v409_v25 = vpack.c.bf16 %v234_v24, %v233_v22 }
  0x2c   :  { %402 = vmatprep.subr.bf16.mxu1 %v474_v0  ;;  %v406_v23 = vpack.c.bf16 %v232_v21, %v231_v20  ;;  %v340_v26 = vld [vmem:[%s604_s4] ss:$0 sm:$0xff] }
  0x2d   :  { %v342_v31 = vld [vmem:[%s606_s6] ss:$0 sm:$0xff] }
  0x2e   :  { %398 = vmatpush3.bf16.msra.mxu0 %v397_v9  ;;  %v344_v35 = vld [vmem:[#allocation5] ss:$0 sm:$0xff] }
  0x2f   :  { %405 = vmatprep.subr.bf16.mxu0 %v474_v0  ;;  %404 = vmatpush3.bf16.msra.mxu1 %v403_v14 }
  0x31   :  { %369 = vmatmul.mubr.msk.f32.vlgmr.msra.gmra.mrb[0].mxu0 %vm71_vm1, %v59_v11 }
  0x32   :  { %390 = vmatprep.mubr.msk.f32.mxu0 %vm475_vm0, %v476_v1  ;;  %407 = vmatpush3.bf16.msra.mxu0 %v406_v23 }
  0x33   :  { %408 = vmatprep.subr.bf16.mxu0 %v474_v0 }
  0x36   :  { %410 = vmatpush3.bf16.msra.mxu0 %v409_v25 }
 0x104   :  { %v141_v16 = vpop.f32.mrb[0].mxu0 }
 0x105   :  { %v142_v17 = vadd.f32 %v338_v15, %v141_v16  ;;  %v370_v18 = vpop.f32.mrb[1].mxu0 }
 0x107   :  { %v145_v19 = vmax.f32 %v142_v17, 0.0 }
 0x109   :  { %380 = vmatmul.mubr.msk.f32.vlgmr.msra.gmra.mrb[0].mxu1 %vm71_vm1, %v145_v19 }
 0x1dc   :  { %v226_v27 = vpop.f32.mrb[0].mxu1 }
 0x1dd   :  { %v227_v28 = vadd.f32 %v340_v26, %v226_v27  ;;  %v381_v29 = vpop.f32.mrb[1].mxu1 }
 0x1df   :  { %418 = vtanh.f32 %v227_v28 }
 0x1e9   :  { %v419_v30 = vpop.eup %418 }
 0x1ea   :  { %391 = vmatmul.mubr.msk.f32.vlgmr.msra.gmra.mrb[2].mxu0 %vm71_vm1, %v419_v30 }
 0x2bd   :  { %v311_v32 = vpop.f32.mrb[2].mxu0 }
 0x2be   :  { %v312_v33 = vadd.f32 %v342_v31, %v311_v32  ;;  %v392_v34 = vpop.f32.mrb[3].mxu0 }
 0x2c0   :  { %420 = vtanh.f32 %v312_v33 }
 0x2ca   :  { %v421_v36 = vpop.eup %420 }
 0x2cb   :  { %v323_v37 = vmul.f32 %v421_v36, %v344_v35 }
 0x2cd   :  { %v324_v38 = vsel %vm71_vm1, %v323_v37, 0.0 }
 0x2ce   :  { %325 = vadd.xlane.f32.xlu0 %v324_v38 }
 0x35b   :  { %v326_v40 = vpop.xlane.xlu0 %325 }
 0x35c   :  { %v329_v41 = vadd.f32 %v328_v39, %v326_v40 }
 0x35e   :  { %331 = vst.msk [vmem:[%s609_s9] sm:$0xff] %vm330_vm2, %v329_v41 }
 0x35f   :  { %336 = vsyncpa [#allocation4], 1 }
 0x360   :  { %337 = vsyncpa [#allocation6], 1 }

</bundles_post_ra>
